<compile_context>
chip_gen: v6e
topology: v6e:2x2x1
jax: 0.10.0
libtpu: 0.0.40
codegen_flags: <defaults>
</compile_context>

<pallas_src>
import jax
import jax.numpy as jnp
from jax.experimental import pallas as pl
from jax.experimental.pallas import tpu as pltpu  # noqa: F401  (TPU backend extensions)

# ---------------- problem sizes (small, consistent with the module) ----------
B = 2            # batch (number of sequence fragments == number of proteins here)
L = 10           # token length incl. BOS/EOS
S = L - 2        # last_hidden_state length
D = 32           # embed_dim
F = 16           # cnn_filter_num
K = 3            # cnn_filter_size (odd -> symmetric 'same' padding)
NUM_CLASSES = 8  # configs.encoder.num_classes
C = NUM_CLASSES
NUM_DEC = NUM_CLASSES - 2      # ParallelLinear has num_classes-2 decoders
PAD_L = (K - 1) // 2
PAD_R = (K - 1) - PAD_L


# ---------------------------- Pallas kernel ----------------------------------
def esm_head_kernel(xc_ref, wbig_ref, whead_ref, bias_ref, motif_ref, cls_ref):
    # One fused matmul over all token rows:
    #   z columns = [motif-placed decoders (C) | type head (C) | conv pre-act (2F)]
    z = jnp.dot(xc_ref[...], wbig_ref[...],
                preferred_element_type=jnp.float32) + bias_ref[...]      # (B*S, 2C+2F)

    conv = jnp.maximum(z[:, 2 * C:], 0.0)                                # ReLU, both CNN heads
    heads = jnp.dot(conv, whead_ref[...],
                    preferred_element_type=jnp.float32)                  # (B*S, C), cols 0 & 5 live

    # decoder logits were pre-permuted into motif positions at fuse time -> one add
    motif_ref[...] = z[:, :C] + heads                                    # (B*S, C)

    # type head: per-token logits already include b_type; mean over tokens
    # commutes with the bias add, so this equals mean(x) @ W_type + b_type.
    cls_ref[...] = jnp.mean(z[:, C:2 * C].reshape(B, S, C), axis=1)      # (B, C)


# ------------------- weight fusing (done ONCE at model-load time) -------------
def fuse_params(p):
    f32 = jnp.float32
    # ParallelLinear columns permuted straight into motif column positions
    # (col 0 = CNN_Nuc, cols 1..4 = dec 0..3, col 5 = CNN_Nuc_exp, cols 6.. = dec 4..).
    w_par_m = jnp.zeros((D, C), f32)
    w_par_m = w_par_m.at[:, 1:5].set(p['w_par'][:, :4]).at[:, 6:].set(p['w_par'][:, 4:])
    b_motif = jnp.zeros((1, C), f32)
    b_motif = b_motif.at[:, 1:5].set(p['b_par'][:, :4]).at[:, 6:].set(p['b_par'][:, 4:])
    b_motif = b_motif.at[:, 0:1].add(p['bl1']).at[:, 5:6].add(p['bl2'])

    wlin = jnp.concatenate([w_par_m, p['w_type']], axis=1)               # (D, 2C)

    # conv taps: both CNN heads along the output (lane) axis, taps stacked along
    # the contraction dim -> (K*D, 2F)
    wc = jnp.concatenate([p['wc1'], p['wc2']], axis=2)                   # (K, D, 2F)
    wc_flat = wc.reshape(K * D, 2 * F)

    # fused "do-everything" weight: linear part zero-padded into the centre-tap rows
    wlin_pad = jnp.zeros((K * D, 2 * C), f32).at[PAD_L * D:(PAD_L + 1) * D].set(wlin)
    w_big = jnp.concatenate([wlin_pad, wc_flat], axis=1)                 # (K*D, 2C+2F)

    # per-head output linear, block-placed at motif cols 0 / 5
    w_head = jnp.zeros((2 * F, C), f32)
    w_head = w_head.at[:F, 0:1].set(p['wl1']).at[F:, 5:6].set(p['wl2'])  # (2F, C)

    # single bias buffer, same column layout as the fused matmul output
    bias = jnp.concatenate([b_motif, p['b_type'], p['bc1'], p['bc2']], axis=1)  # (1, 2C+2F)
    return w_big, w_head, bias


# ------------------------------ forward (jitted) ------------------------------
@jax.jit
def official_esm_encoder_forward(features, w_big, w_head, bias):
    """features: (B, L, D) float32 — synthetic ESM representations."""
    x3 = features[:, 1:-1, :]                                            # (B, S, D)
    # 'same'-padded shifted taps, flattened & lane-concatenated -> (B*S, K*D).
    # Fused by XLA inside this jit; centre tap (k == PAD_L) is x itself.
    xp = jnp.pad(x3, ((0, 0), (PAD_L, PAD_R), (0, 0)))
    xc = jnp.concatenate(
        [xp[:, k:k + S, :].reshape(B * S, D) for k in range(K)], axis=1)  # (B*S, K*D)

    # single grid-less invocation: everything fits comfortably in VMEM, so all
    # operands/outputs are whole-array VMEM blocks (default BlockSpecs).
    motif_flat, cls = pl.pallas_call(
        esm_head_kernel,
        out_shape=(jax.ShapeDtypeStruct((B * S, C), jnp.float32),
                   jax.ShapeDtypeStruct((B, C), jnp.float32)),
    )(xc, w_big, w_head, bias)

    motif_logits = motif_flat.reshape(B, S, C).transpose(0, 2, 1)        # (B, C, S) PyTorch order
    return cls, motif_logits, None


# --------------------------- pure-JAX reference --------------------------------
def reference_forward(features, params):
    x = features[:, 1:-1, :]                                             # (B, S, D)
    par = jnp.einsum('bsd,dc->bsc', x, params['w_par']) + params['b_par'][0]

    def cnn(wc, bc, wl, bl):
        xp = jnp.pad(x, ((0, 0), (PAD_L, PAD_R), (0, 0)))
        conv = sum(jnp.einsum('bsd,df->bsf', xp[:, k:k + S], wc[k])
                   for k in range(K)) + bc[0]
        conv = jnp.maximum(conv, 0.0)
        return (jnp.einsum('bsf,fo->bso', conv, wl) + bl[0])[..., 0]     # (B, S)

    nuc = cnn(params['wc1'], params['bc1'], params['wl1'], params['bl1'])
    nuc_exp = cnn(params['wc2'], params['bc2'], params['wl2'], params['bl2'])
    par_t = jnp.transpose(par, (0, 2, 1))                                # (B, NUM_DEC, S)
    motif = jnp.concatenate(
        [nuc[:, None], par_t[:, :4], nuc_exp[:, None], par_t[:, 4:]], axis=1)
    emb = jnp.mean(x, axis=1)                                            # (B, D)
    cls = emb @ params['w_type'] + params['b_type'][0]
    return cls, motif


# ------------------------------- main ------------------------------------------
if __name__ == "__main__":
    key = jax.random.PRNGKey(0)
    ks = jax.random.split(key, 16)
    init = lambda k, shape: (0.1 * jax.random.normal(k, shape)).astype(jnp.float32)

    params = {
        # ParallelLinear: NUM_DEC x nn.Linear(D, 1), stacked & pre-transposed to (D, NUM_DEC)
        'w_par': init(ks[0], (D, NUM_DEC)), 'b_par': init(ks[1], (1, NUM_DEC)),
        # ProteinCNN #1: Conv1d weight (F, D, K) stored as (K, D, F); Linear(F, 1) as (F, 1)
        'wc1': init(ks[2], (K, D, F)), 'bc1': init(ks[3], (1, F)),
        'wl1': init(ks[4], (F, 1)), 'bl1': init(ks[5], (1, 1)),
        # ProteinCNN #2
        'wc2': init(ks[6], (K, D, F)), 'bc2': init(ks[7], (1, F)),
        'wl2': init(ks[8], (F, 1)), 'bl2': init(ks[9], (1, 1)),
        # type_head: nn.Linear(D, C), pre-transposed to (D, C)
        'w_type': init(ks[10], (D, C)), 'b_type': init(ks[11], (1, C)),
    }

    # synthetic ESM backbone output (see TODO at top)
    features = jax.random.normal(ks[12], (B, L, D), dtype=jnp.float32)

    # --- "model load": fuse the weights once, outside the per-call path ---------
    w_big, w_head, bias = jax.block_until_ready(fuse_params(params))

    cls, motif, _ = official_esm_encoder_forward(features, w_big, w_head, bias)
    jax.block_until_ready((cls, motif))

    cls_ref, motif_ref = reference_forward(features, params)
    assert cls.shape == (B, C)
    assert motif.shape == (B, C, S)
    assert jnp.allclose(cls, cls_ref, atol=1e-4, rtol=1e-4)
    assert jnp.allclose(motif, motif_ref, atol=1e-4, rtol=1e-4)

    print("KERNEL_OK")
</pallas_src>

<mosaic_0001>
module attributes {stable_mosaic.version = 11 : i64} {
  func.func @esm_head_kernel(%arg0: memref<16x96xf32, #tpu.memory_space<vmem>>, %arg1: memref<96x48xf32, #tpu.memory_space<vmem>>, %arg2: memref<32x8xf32, #tpu.memory_space<vmem>>, %arg3: memref<1x48xf32, #tpu.memory_space<vmem>>, %arg4: memref<16x8xf32, #tpu.memory_space<vmem>>, %arg5: memref<2x8xf32, #tpu.memory_space<vmem>>) attributes {dimension_semantics = [], scalar_prefetch = 0 : i64, scratch_operands = 0 : i64, tpu.core_type = #tpu.core_type<tc>} {
    %c0 = arith.constant 0 : index
    %c0_0 = arith.constant 0 : index
    %0 = vector.load %arg0[%c0, %c0_0] : memref<16x96xf32, #tpu.memory_space<vmem>>, vector<16x96xf32>
    %c0_1 = arith.constant 0 : index
    %c0_2 = arith.constant 0 : index
    %1 = vector.load %arg1[%c0_1, %c0_2] : memref<96x48xf32, #tpu.memory_space<vmem>>, vector<96x48xf32>
    %cst = arith.constant dense<0.000000e+00> : vector<16x48xf32>
    %2 = tpu.matmul %0, %1, %cst {dimension_numbers = #tpu.dot_dimension_numbers<[1], [0], [0], [1], [0, 0, 1, 1], [], []>} : vector<16x96xf32>, vector<96x48xf32>, vector<16x48xf32> -> vector<16x48xf32>
    %c0_3 = arith.constant 0 : index
    %c0_4 = arith.constant 0 : index
    %3 = vector.load %arg3[%c0_3, %c0_4] : memref<1x48xf32, #tpu.memory_space<vmem>>, vector<1x48xf32>
    %4 = vector.broadcast %3 : vector<1x48xf32> to vector<16x48xf32>
    %5 = arith.addf %2, %4 : vector<16x48xf32>
    %6 = vector.extract_strided_slice %5 {offsets = [0, 16], sizes = [16, 32], strides = [1, 1]} : vector<16x48xf32> to vector<16x32xf32>
    %cst_5 = arith.constant 0.000000e+00 : f32
    %7 = vector.broadcast %cst_5 : f32 to vector<16x32xf32>
    %8 = arith.maximumf %6, %7 : vector<16x32xf32>
    %c0_6 = arith.constant 0 : index
    %c0_7 = arith.constant 0 : index
    %9 = vector.load %arg2[%c0_6, %c0_7] : memref<32x8xf32, #tpu.memory_space<vmem>>, vector<32x8xf32>
    %cst_8 = arith.constant dense<0.000000e+00> : vector<16x8xf32>
    %10 = tpu.matmul %8, %9, %cst_8 {dimension_numbers = #tpu.dot_dimension_numbers<[1], [0], [0], [1], [0, 0, 1, 1], [], []>} : vector<16x32xf32>, vector<32x8xf32>, vector<16x8xf32> -> vector<16x8xf32>
    %11 = vector.extract_strided_slice %5 {offsets = [0, 0], sizes = [16, 8], strides = [1, 1]} : vector<16x48xf32> to vector<16x8xf32>
    %12 = arith.addf %11, %10 : vector<16x8xf32>
    %c0_9 = arith.constant 0 : index
    %c0_10 = arith.constant 0 : index
    %13 = vector.load %arg4[%c0_9, %c0_10] : memref<16x8xf32, #tpu.memory_space<vmem>>, vector<16x8xf32>
    tpu.vector_store %arg4[%c0_9, %c0_10], %12 {strides = array<i32>} : memref<16x8xf32, #tpu.memory_space<vmem>>, vector<16x8xf32>,
    %14 = vector.extract_strided_slice %5 {offsets = [0, 8], sizes = [16, 8], strides = [1, 1]} : vector<16x48xf32> to vector<16x8xf32>
    %15 = vector.shape_cast %14 : vector<16x8xf32> to vector<2x8x8xf32>
    %cst_11 = arith.constant dense<0.000000e+00> : vector<2x8xf32>
    %16 = vector.multi_reduction <add>, %15, %cst_11 [1] : vector<2x8x8xf32> to vector<2x8xf32>
    %cst_12 = arith.constant 8.000000e+00 : f32
    %17 = vector.broadcast %cst_12 : f32 to vector<2x8xf32>
    %18 = arith.divf %16, %17 : vector<2x8xf32>
    %c0_13 = arith.constant 0 : index
    %c0_14 = arith.constant 0 : index
    %19 = vector.load %arg5[%c0_13, %c0_14] : memref<2x8xf32, #tpu.memory_space<vmem>>, vector<2x8xf32>
    tpu.vector_store %arg5[%c0_13, %c0_14], %18 {strides = array<i32>} : memref<2x8xf32, #tpu.memory_space<vmem>>, vector<2x8xf32>,
    return
  }
}

</mosaic_0001>

<bundles_post_ra>
// kernel: official_esm_encoder_forward.1
= control target key start
LH: loop header
LB: loop body
LE: loop exit
PB: predicated region body
PF: predicated region fallthrough
CT: control target
= control target key end

     0   :  { %vm41_vm0 = vcmask 785408   ;;  %s454_s0 = inlined_call_operand.vmem [shape: f32[16,96], index: 0, kind: input, shape index: {}]   ;;  %s455_s1 = inlined_call_operand.vmem [shape: f32[96,48], index: 1, kind: input, shape index: {}]   ;;  %s456_s2 = inlined_call_operand.vmem [shape: f32[32,8], index: 2, kind: input, shape index: {}]   ;;  %s457_s3 = inlined_call_operand.vmem [shape: f32[1,48], index: 3, kind: input, shape index: {}]   ;;  %s458_s4 = inlined_call_operand.vmem [shape: f32[16,8], index: 4, kind: output, shape index: {0}]   ;;  %s459_s5 = inlined_call_operand.hbm [shape: f32[2,8], index: 5, kind: output, shape index: {1}]  }
   0x1   :  { %v33_v0 = vld [vmem:[%s455_s1 + $0x58] sm:$0xff]  ;;  %v32_v1 = vld [vmem:[%s455_s1 + $0x50] sm:$0xff]  ;;  %v31_v2 = vld [vmem:[%s455_s1 + $0x48] sm:$0xff] }
   0x2   :  { %290 = vmatprep.subr.mxu0 %v33_v0  ;;  %v30_v3 = vld [vmem:[%s455_s1 + $0x40] sm:$0xff] }
   0x3   :  { %291 = vmatpush3.msra.mxu0 %v33_v0  ;;  %v20_v4 = vld [vmem:[%s454_s0] sm:$0xff] }
   0x4   :  { %292 = vmatprep.subr.mxu0 %v32_v1 }
   0x5   :  { %293 = vmatpush3.msra.mxu0 %v32_v1 }
   0x6   :  { %11 = vsyncpa [#allocation3], 0  ;;  %294 = vmatprep.subr.mxu0 %v31_v2  ;;  %314 = vmatprep.mubr.msk.f32.mxu0 %vm41_vm0, %v20_v4  ;;  %v29_v5 = vld [vmem:[%s455_s1 + $0x38] sm:$0xff]  ;;  %v28_v6 = vld [vmem:[%s455_s1 + $0x30] sm:$0xff]  ;;  %vm220_vm1 = vcmask 130112   ;;  %s353_s29 = smov 112  }
   0x7   :  { %295 = vmatpush3.msra.mxu0 %v31_v2  ;;  %v27_v7 = vld [vmem:[%s455_s1 + $0x28] sm:$0xff]  ;;  %v26_v8 = vld [vmem:[%s455_s1 + $0x20] sm:$0xff]  ;;  %v25_v9 = vld [vmem:[%s455_s1 + $0x18] sm:$0xff]  ;;  %vm240_vm2 = vcmask 1041409   ;;  %vm135_vm3 = vcmask 261120   ;;  %vm245_vm4 = vcmask 58368  }
   0x8   :  { %296 = vmatprep.subr.mxu0 %v30_v3  ;;  %v24_v10 = vld [vmem:[%s455_s1 + $0x10] sm:$0xff]  ;;  %v23_v11 = vld [vmem:[%s455_s1 + $0x8] sm:$0xff]  ;;  %v22_v12 = vld [vmem:[%s455_s1] sm:$0xff] }
   0x9   :  { %297 = vmatpush3.msra.mxu0 %v30_v3  ;;  %v21_v13 = vld [vmem:[%s454_s0 + $0x8] sm:$0xff]  ;;  %v128_v14 = vld [vmem:[%s456_s2 + $0x18] sm:$0xff]  ;;  %v127_v15 = vld [vmem:[%s456_s2 + $0x10] sm:$0xff] }
   0xa   :  { %298 = vmatprep.subr.mxu0 %v29_v5  ;;  %317 = vmatprep.subr.mxu1 %v128_v14  ;;  %v126_v16 = vld [vmem:[%s456_s2 + $0x8] sm:$0xff]  ;;  %v125_v17 = vld [vmem:[%s456_s2] sm:$0xff]  ;;  %s354_s2 = smov 120  }
   0xb   :  { %299 = vmatpush3.msra.mxu0 %v29_v5  ;;  %318 = vmatpush3.msra.mxu1 %v128_v14  ;;  %v265_v18 = vld [vmem:[%s457_s3] ss:$0 sm:$0xff]  ;;  %s355_s3 = smov [#allocation2]  }
   0xc   :  { %300 = vmatprep.subr.mxu0 %v28_v6  ;;  %319 = vmatprep.subr.mxu1 %v127_v15  ;;  %s255_s30 = sshll.u32 %s355_s3, 4  ;;  %s256_s30 = int_to_ptr.vmem [resolvable:$true] %s255_s30 }
   0xd   :  { %301 = vmatpush3.msra.mxu0 %v28_v6  ;;  %320 = vmatpush3.msra.mxu1 %v127_v15  ;;  %s331_s6 = scalar_lea.vmem %s256_s30, 32  ;;  %p336_p1 = scmp.lt.s32.totalorder %s256_s30, %s256_s30 }
   0xe   :  { %302 = vmatprep.subr.mxu0 %v27_v7  ;;  %321 = vmatprep.subr.mxu1 %v126_v16  ;;  %p332_p0 = scmp.ne.s32.totalorder %s256_s30, %s331_s6  ;;  %p337_p2 = scmp.lt.s32.totalorder %s331_s6, %s331_s6 }
   0xf   :  { %303 = vmatpush3.msra.mxu0 %v27_v7  ;;  %322 = vmatpush3.msra.mxu1 %v126_v16 }
  0x10   :  { %304 = vmatprep.subr.mxu0 %v26_v8  ;;  %323 = vmatprep.subr.mxu1 %v125_v17  ;;  %p338_p3 = por %p337_p2, %p336_p1 }
  0x11   :  { %305 = vmatpush3.msra.mxu0 %v26_v8  ;;  %324 = vmatpush3.msra.mxu1 %v125_v17 }
  0x12   :  { %306 = vmatprep.subr.mxu0 %v25_v9  ;;  %p339_p4 = pnand %p338_p3, %p332_p0 }
  0x13   :  { %307 = vmatpush3.msra.mxu0 %v25_v9 }
  0x14   :  { %308 = vmatprep.subr.mxu0 %v24_v10 }
  0x15   :  { %309 = vmatpush3.msra.mxu0 %v24_v10 }
  0x16   :  { %310 = vmatprep.subr.mxu0 %v23_v11 }
  0x17   :  { %311 = vmatpush3.msra.mxu0 %v23_v11 }
  0x18   :  { %312 = vmatprep.subr.mxu0 %v22_v12 }
  0x19   :  { %313 = vmatpush3.msra.mxu0 %v22_v12 }
  0x1a   :  { %315 = vmatmul.mubr.msk.f32.vlgmr.msra.gmra.mxu0 %vm41_vm0, %v21_v13 }
  0xda   :  { %v316_v19 = vpop.f32.mrf.mxu0 }
  0xdb   :  { %v120_v20 = vadd.f32 %v316_v19, %v265_v18 }
  0xdc   :  { %v114_v21 = vpop.f32.mrf.mxu0 }
  0xdd   :  { %v228_v22 = vsel %vm220_vm1, %v120_v20, 0.0  ;;  %v115_v23 = vadd.f32 %v265_v18, %v114_v21  ;;  %v124_v31 = vmax.f32 %v120_v20, 0.0 }
  0xde   :  { %v229_v24 = vrot.slane %v228_v22, 4 }
  0xdf   :  { %v221_v25 = vsel %vm220_vm1, %v115_v23, 0.0  ;;  %v123_v26 = vmax.f32 %v115_v23, 0.0 }
  0xe0   :  { %v230_v27 = vadd.f32 %v229_v24, %v228_v22  ;;  %v222_v28 = vrot.slane %v221_v25, 4 }
  0xe1   :  { %131 = vrot.lane.b32.xlu0 %v123_v26, %s353_s29 }
  0xe2   :  { %v231_v29 = vrot.slane %v230_v27, 2  ;;  %v223_v30 = vadd.f32 %v222_v28, %v221_v25 }
  0xe4   :  { %v224_v32 = vrot.slane %v223_v30, 2  ;;  %v232_v33 = vadd.f32 %v231_v29, %v230_v27 }
  0xe5   :  { %133 = vrot.lane.b32.xlu0 %v124_v31, %s353_s29 }
  0xe6   :  { %v225_v34 = vadd.f32 %v224_v32, %v223_v30  ;;  %v233_v35 = vrot.slane %v232_v33, 1 }
  0xe8   :  { %v226_v36 = vrot.slane %v225_v34, 1  ;;  %v234_v37 = vadd.f32 %v233_v35, %v232_v33 }
  0xea   :  { %v227_v38 = vadd.f32 %v226_v36, %v225_v34  ;;  %v237_v40 = vmul.f32 0.125, %v234_v37 }
  0xec   :  { %v236_v39 = vmul.f32 0.125, %v227_v38 }
  0xee   :  { %v241_v41 = vsel %vm240_vm2, %v237_v40, %v236_v39 }
  0xef   :  { %242 = vrot.lane.b32.xlu1 %v241_v41, %s354_s2 }
 0x153   :  { %v132_v42 = vpop.permute.xlu0 %131 }
 0x154   :  { %325 = vmatprep.mubr.msk.f32.mxu1 %vm135_vm3, %v132_v42 }
 0x157   :  { %v134_v43 = vpop.permute.xlu0 %133 }
 0x158   :  { %326 = vmatmul.mubr.msk.f32.vlgmr.msra.gmra.mxu1 %vm135_vm3, %v134_v43 }
 0x161   :  { %v243_v44 = vpop.permute.xlu1 %242 }
 0x162   :  { %246 = vst.msk [vmem:[#allocation2] sm:$0x3] %vm245_vm4, %v243_v44 }
 0x163   :  { %342 = shalt.err (!%p339_p4)
}
 0x164   :  { %258 = dma.vmem_to_hbm [thread:$0]  %s256_s30, 32, %s459_s5, [#allocation3]   ;;  %vm217_vm5 = vcmask 64512  }
 0x218   :  { %v327_v45 = vpop.f32.mrf.mxu1 }
 0x219   :  { %v216_v46 = vadd.f32 %v327_v45, %v120_v20 }
 0x21a   :  { %v206_v47 = vpop.f32.mrf.mxu1 }
 0x21b   :  { %219 = vst.msk [vmem:[%s458_s4 + $0x8] sm:$0xff] %vm217_vm5, %v216_v46  ;;  %v215_v48 = vadd.f32 %v206_v47, %v115_v23 }
 0x21d   :  { %218 = vst.msk [vmem:[%s458_s4] sm:$0xff] %vm217_vm5, %v215_v48 }
 0x21e   :  { %351 = dma.done.wait [#allocation3], 32  }
 0x21f   :  { %352 = vsyncadd [#allocation3], 4294967264 }
 0x220   :  { %264 = vsyncpa [#allocation3], 1 }

</bundles_post_ra>
